<compile_context>
chip_gen: v6e
topology: v6e:2x2x1
jax: 0.10.0
libtpu: 0.0.40
codegen_flags: <defaults>
</compile_context>

<pallas_src>
import functools

import jax
import jax.numpy as jnp
from jax.experimental import pallas as pl
from jax.experimental.pallas import tpu as pltpu

_LANE = 128   # vreg lane width
_SUB = 8      # f32 sublane granularity


def _round_up(x, m):
    return (x + m - 1) // m * m


def predictor_kernel(x_ref, w1_ref, b1_ref, w2_ref, b2_ref, o_ref):
    # Hot path: two MXU matmuls + VPU relu, fused in one kernel body.
    x = x_ref[...]
    h = jnp.dot(x, w1_ref[...], preferred_element_type=jnp.float32)
    h = jnp.maximum(h + b1_ref[...].astype(jnp.float32), 0.0)        # ReLU (VPU)
    y = jnp.dot(h.astype(w2_ref.dtype), w2_ref[...],
                preferred_element_type=jnp.float32)
    o_ref[...] = (y + b2_ref[...].astype(jnp.float32)).astype(o_ref.dtype)


@functools.partial(jax.jit, static_argnames=("tb",))
def predictor_forward(x, w1, b1, w2, b2, *, tb=256):
    """x: [B, nfeat]; w1: [nfeat, nhid]; w2: [nhid, nout]. Returns [B, nout]."""
    B, nfeat = x.shape
    nhid = w1.shape[1]
    nout = w2.shape[1]

    # Lane-dense padded feature dims (exact: zero rows/cols contribute 0).
    nfeat_p = _round_up(nfeat, _LANE)
    nhid_p = _round_up(nhid, _LANE)
    nout_p = _round_up(nout, _LANE)

    # MXU-aligned batch tile: as large as requested, but never bigger than the
    # (sublane-rounded) batch; always a multiple of the f32 sublane count.
    tb_eff = _round_up(min(tb, _round_up(B, _SUB)), _SUB)
    B_p = _round_up(B, tb_eff)

    def pad2(a, r, c):
        # Skip the op entirely when no padding is needed (trace-time check).
        if r == a.shape[0] and c == a.shape[1]:
            return a
        return jnp.pad(a, ((0, r - a.shape[0]), (0, c - a.shape[1])))

    dt = x.dtype
    x_p = pad2(x, B_p, nfeat_p)
    w1_p = pad2(w1, nfeat_p, nhid_p)
    b1_p = pad2(b1.reshape(1, -1), 1, nhid_p)
    w2_p = pad2(w2, nhid_p, nout_p)
    b2_p = pad2(b2.reshape(1, -1), 1, nout_p)

    grid = (B_p // tb_eff,)

    itemsize = jnp.dtype(dt).itemsize
    flops = 2 * B_p * (nfeat_p * nhid_p + nhid_p * nout_p)
    bytes_accessed = itemsize * (
        B_p * nfeat_p                # x in
        + nfeat_p * nhid_p + nhid_p  # w1, b1
        + nhid_p * nout_p + nout_p   # w2, b2
        + B_p * nout_p               # out
    )

    out_p = pl.pallas_call(
        predictor_kernel,
        out_shape=jax.ShapeDtypeStruct((B_p, nout_p), dt),
        grid_spec=pltpu.PrefetchScalarGridSpec(
            num_scalar_prefetch=0,
            grid=grid,
            in_specs=[
                # batch rows are tiled; weights/biases have constant block
                # indices so they stay resident in VMEM across grid steps.
                pl.BlockSpec((tb_eff, nfeat_p), lambda i: (i, 0)),
                pl.BlockSpec((nfeat_p, nhid_p), lambda i: (0, 0)),
                pl.BlockSpec((1, nhid_p), lambda i: (0, 0)),
                pl.BlockSpec((nhid_p, nout_p), lambda i: (0, 0)),
                pl.BlockSpec((1, nout_p), lambda i: (0, 0)),
            ],
            out_specs=pl.BlockSpec((tb_eff, nout_p), lambda i: (i, 0)),
        ),
        compiler_params=pltpu.CompilerParams(
            dimension_semantics=("parallel",)),
        cost_estimate=pl.CostEstimate(
            flops=flops, transcendentals=0, bytes_accessed=bytes_accessed),
    )(x_p, w1_p, b1_p, w2_p, b2_p)

    # Slice away batch / output-lane padding.
    return out_p[:B, :nout]


def reference_forward(x, w1, b1, w2, b2):
    h = jnp.maximum(x @ w1 + b1.reshape(1, -1), 0.0)
    return h @ w2 + b2.reshape(1, -1)


def _make_params(key, nfeat, nhid, nout, dtype=jnp.float32):
    k1, kb1, k2, kb2 = jax.random.split(key, 4)
    w1 = jax.random.normal(k1, (nfeat, nhid), dtype=dtype) / jnp.sqrt(nfeat)
    b1 = jax.random.normal(kb1, (1, nhid), dtype=dtype) * 0.1
    w2 = jax.random.normal(k2, (nhid, nout), dtype=dtype) / jnp.sqrt(nhid)
    b2 = jax.random.normal(kb2, (1, nout), dtype=dtype) * 0.1
    return w1, b1, w2, b2


if __name__ == "__main__":
    key = jax.random.PRNGKey(0)

    # Case 1: small shapes consistent with Predictor(nfeat, nhid, nout).
    B, nfeat, nhid, nout = 16, 32, 64, 16
    kx, kp = jax.random.split(key)
    x = jax.random.normal(kx, (B, nfeat), dtype=jnp.float32)
    w1, b1, w2, b2 = _make_params(kp, nfeat, nhid, nout)

    out = jax.block_until_ready(predictor_forward(x, w1, b1, w2, b2))
    ref = reference_forward(x, w1, b1, w2, b2)
    assert out.shape == (B, nout)
    assert jnp.allclose(out, ref, atol=1e-4, rtol=1e-4), "mismatch (small case)"

    # Case 2: exercises the padded / multi-tile path (non-128-aligned dims,
    # multiple batch tiles so the grid has >1 step).
    B2, nf2, nh2, no2 = 512, 200, 300, 40
    kx2, kp2 = jax.random.split(kp)
    x2 = jax.random.normal(kx2, (B2, nf2), dtype=jnp.float32)
    w1b, b1b, w2b, b2b = _make_params(kp2, nf2, nh2, no2)

    out2 = jax.block_until_ready(
        predictor_forward(x2, w1b, b1b, w2b, b2b, tb=256))
    ref2 = reference_forward(x2, w1b, b1b, w2b, b2b)
    assert out2.shape == (B2, no2)
    assert jnp.allclose(out2, ref2, atol=2e-4, rtol=2e-4), "mismatch (tiled case)"

    print("KERNEL_OK")
</pallas_src>

<mosaic_0001>
module attributes {stable_mosaic.version = 11 : i64} {
  func.func @predictor_kernel(%arg0: i32, %arg1: memref<16x128xf32, #tpu.memory_space<vmem>>, %arg2: memref<128x128xf32, #tpu.memory_space<vmem>>, %arg3: memref<1x128xf32, #tpu.memory_space<vmem>>, %arg4: memref<128x128xf32, #tpu.memory_space<vmem>>, %arg5: memref<1x128xf32, #tpu.memory_space<vmem>>, %arg6: memref<16x128xf32, #tpu.memory_space<vmem>>) attributes {dimension_semantics = [#tpu.dimension_semantics<parallel>], iteration_bounds = array<i64: 1>, scalar_prefetch = 0 : i64, scratch_operands = 0 : i64, tpu.core_type = #tpu.core_type<tc>, window_params = [{transform_indices = @transform_0, window_bounds = array<i64: 16, 128>}, {pipeline_mode = #tpu.pipeline_mode<synchronous>, transform_indices = @transform_1, window_bounds = array<i64: 128, 128>}, {pipeline_mode = #tpu.pipeline_mode<synchronous>, transform_indices = @transform_2, window_bounds = array<i64: 1, 128>}, {pipeline_mode = #tpu.pipeline_mode<synchronous>, transform_indices = @transform_3, window_bounds = array<i64: 128, 128>}, {pipeline_mode = #tpu.pipeline_mode<synchronous>, transform_indices = @transform_4, window_bounds = array<i64: 1, 128>}, {transform_indices = @transform_5, window_bounds = array<i64: 16, 128>}]} {
    %c0 = arith.constant 0 : index
    %c0_0 = arith.constant 0 : index
    %0 = vector.load %arg1[%c0, %c0_0] : memref<16x128xf32, #tpu.memory_space<vmem>>, vector<16x128xf32>
    %c0_1 = arith.constant 0 : index
    %c0_2 = arith.constant 0 : index
    %1 = vector.load %arg2[%c0_1, %c0_2] : memref<128x128xf32, #tpu.memory_space<vmem>>, vector<128x128xf32>
    %cst = arith.constant dense<0.000000e+00> : vector<16x128xf32>
    %2 = tpu.matmul %0, %1, %cst {dimension_numbers = #tpu.dot_dimension_numbers<[1], [0], [0], [1], [0, 0, 1, 1], [], []>} : vector<16x128xf32>, vector<128x128xf32>, vector<16x128xf32> -> vector<16x128xf32>
    %c0_3 = arith.constant 0 : index
    %c0_4 = arith.constant 0 : index
    %3 = vector.load %arg3[%c0_3, %c0_4] : memref<1x128xf32, #tpu.memory_space<vmem>>, vector<1x128xf32>
    %4 = vector.broadcast %3 : vector<1x128xf32> to vector<16x128xf32>
    %5 = arith.addf %2, %4 : vector<16x128xf32>
    %cst_5 = arith.constant 0.000000e+00 : f32
    %6 = vector.broadcast %cst_5 : f32 to vector<16x128xf32>
    %7 = arith.maximumf %5, %6 : vector<16x128xf32>
    %c0_6 = arith.constant 0 : index
    %c0_7 = arith.constant 0 : index
    %8 = vector.load %arg4[%c0_6, %c0_7] : memref<128x128xf32, #tpu.memory_space<vmem>>, vector<128x128xf32>
    %cst_8 = arith.constant dense<0.000000e+00> : vector<16x128xf32>
    %9 = tpu.matmul %7, %8, %cst_8 {dimension_numbers = #tpu.dot_dimension_numbers<[1], [0], [0], [1], [0, 0, 1, 1], [], []>} : vector<16x128xf32>, vector<128x128xf32>, vector<16x128xf32> -> vector<16x128xf32>
    %c0_9 = arith.constant 0 : index
    %c0_10 = arith.constant 0 : index
    %10 = vector.load %arg5[%c0_9, %c0_10] : memref<1x128xf32, #tpu.memory_space<vmem>>, vector<1x128xf32>
    %11 = vector.broadcast %10 : vector<1x128xf32> to vector<16x128xf32>
    %12 = arith.addf %9, %11 : vector<16x128xf32>
    %c0_11 = arith.constant 0 : index
    %c0_12 = arith.constant 0 : index
    %13 = vector.load %arg6[%c0_11, %c0_12] : memref<16x128xf32, #tpu.memory_space<vmem>>, vector<16x128xf32>
    tpu.vector_store %arg6[%c0_11, %c0_12], %12 {strides = array<i32>} : memref<16x128xf32, #tpu.memory_space<vmem>>, vector<16x128xf32>,
    return
  }
  func.func @transform_0(%arg0: i32) -> (i32, i32) {
    %c0_i32 = arith.constant 0 : i32
    %c0_i32_0 = arith.constant 0 : i32
    return %arg0, %c0_i32 : i32, i32
  }
  func.func @transform_1(%arg0: i32) -> (i32, i32) {
    %c0_i32 = arith.constant 0 : i32
    %c0_i32_0 = arith.constant 0 : i32
    %c0_i32_1 = arith.constant 0 : i32
    return %c0_i32, %c0_i32_0 : i32, i32
  }
  func.func @transform_2(%arg0: i32) -> (i32, i32) {
    %c0_i32 = arith.constant 0 : i32
    %c0_i32_0 = arith.constant 0 : i32
    %c0_i32_1 = arith.constant 0 : i32
    return %c0_i32, %c0_i32_0 : i32, i32
  }
  func.func @transform_3(%arg0: i32) -> (i32, i32) {
    %c0_i32 = arith.constant 0 : i32
    %c0_i32_0 = arith.constant 0 : i32
    %c0_i32_1 = arith.constant 0 : i32
    return %c0_i32, %c0_i32_0 : i32, i32
  }
  func.func @transform_4(%arg0: i32) -> (i32, i32) {
    %c0_i32 = arith.constant 0 : i32
    %c0_i32_0 = arith.constant 0 : i32
    %c0_i32_1 = arith.constant 0 : i32
    return %c0_i32, %c0_i32_0 : i32, i32
  }
  func.func @transform_5(%arg0: i32) -> (i32, i32) {
    %c0_i32 = arith.constant 0 : i32
    %c0_i32_0 = arith.constant 0 : i32
    return %arg0, %c0_i32 : i32, i32
  }
}

</mosaic_0001>

<bundles_post_ra>
// kernel: predictor_forward.1
= control target key start
LH: loop header
LB: loop body
LE: loop exit
PB: predicated region body
PF: predicated region fallthrough
CT: control target
= control target key end

     0   :  { %s516_s0 = inlined_call_operand.vmem [shape: f32[16,128], index: 0, kind: input, shape index: {}]   ;;  %s517_s1 = inlined_call_operand.vmem [shape: f32[128,128], index: 1, kind: input, shape index: {}]   ;;  %s518_s2 = inlined_call_operand.vmem [shape: f32[1,128], index: 2, kind: input, shape index: {}]   ;;  %s519_s3 = inlined_call_operand.vmem [shape: f32[128,128], index: 3, kind: input, shape index: {}]   ;;  %s520_s4 = inlined_call_operand.vmem [shape: f32[1,128], index: 4, kind: input, shape index: {}]   ;;  %s521_s5 = inlined_call_operand.hbm [shape: f32[16,128], index: 5, kind: output, shape index: {}]  }
   0x1   :  { %v38_v0 = vld [vmem:[%s517_s1 + $0x78] sm:$0xff]  ;;  %v37_v1 = vld [vmem:[%s517_s1 + $0x70] sm:$0xff]  ;;  %v36_v2 = vld [vmem:[%s517_s1 + $0x68] sm:$0xff] }
   0x2   :  { %277 = vmatprep.subr.mxu0 %v38_v0  ;;  %v35_v3 = vld [vmem:[%s517_s1 + $0x60] sm:$0xff]  ;;  %v34_v5 = vld [vmem:[%s517_s1 + $0x58] sm:$0xff]  ;;  %v137_v7 = vld [vmem:[%s519_s3 + $0x70] sm:$0xff] }
   0x3   :  { %278 = vmatpush3.msra.mxu0 %v38_v0  ;;  %v21_v4 = vld [vmem:[%s516_s0] sm:$0xff]  ;;  %v138_v6 = vld [vmem:[%s519_s3 + $0x78] sm:$0xff]  ;;  %v33_v8 = vld [vmem:[%s517_s1 + $0x50] sm:$0xff] }
   0x4   :  { %279 = vmatprep.subr.mxu0 %v37_v1  ;;  %309 = vmatprep.mubr.f32.mxu0 %v21_v4  ;;  %v136_v9 = vld [vmem:[%s519_s3 + $0x68] sm:$0xff]  ;;  %v135_v11 = vld [vmem:[%s519_s3 + $0x60] sm:$0xff] }
   0x5   :  { %280 = vmatpush3.msra.mxu0 %v37_v1  ;;  %312 = vmatprep.subr.mxu1 %v138_v6  ;;  %v32_v10 = vld [vmem:[%s517_s1 + $0x48] sm:$0xff] }
   0x6   :  { %281 = vmatprep.subr.mxu0 %v36_v2  ;;  %313 = vmatpush3.msra.mxu1 %v138_v6 }
   0x7   :  { %282 = vmatpush3.msra.mxu0 %v36_v2  ;;  %314 = vmatprep.subr.mxu1 %v137_v7 }
   0x8   :  { %283 = vmatprep.subr.mxu0 %v35_v3  ;;  %315 = vmatpush3.msra.mxu1 %v137_v7 }
   0x9   :  { %284 = vmatpush3.msra.mxu0 %v35_v3 }
   0xa   :  { %285 = vmatprep.subr.mxu0 %v34_v5 }
   0xb   :  { %286 = vmatpush3.msra.mxu0 %v34_v5 }
   0xc   :  { %10 = vsyncpa [#allocation3], 0  ;;  %287 = vmatprep.subr.mxu0 %v33_v8  ;;  %316 = vmatprep.subr.mxu1 %v136_v9  ;;  %v31_v12 = vld [vmem:[%s517_s1 + $0x40] sm:$0xff]  ;;  %v134_v13 = vld [vmem:[%s519_s3 + $0x58] sm:$0xff] }
   0xd   :  { %288 = vmatpush3.msra.mxu0 %v33_v8  ;;  %317 = vmatpush3.msra.mxu1 %v136_v9  ;;  %v30_v14 = vld [vmem:[%s517_s1 + $0x38] sm:$0xff]  ;;  %v133_v15 = vld [vmem:[%s519_s3 + $0x50] sm:$0xff]  ;;  %v132_v17 = vld [vmem:[%s519_s3 + $0x48] sm:$0xff] }
   0xe   :  { %289 = vmatprep.subr.mxu0 %v32_v10  ;;  %318 = vmatprep.subr.mxu1 %v135_v11  ;;  %v29_v16 = vld [vmem:[%s517_s1 + $0x30] sm:$0xff]  ;;  %v28_v18 = vld [vmem:[%s517_s1 + $0x28] sm:$0xff]  ;;  %v131_v19 = vld [vmem:[%s519_s3 + $0x40] sm:$0xff] }
   0xf   :  { %290 = vmatpush3.msra.mxu0 %v32_v10  ;;  %319 = vmatpush3.msra.mxu1 %v135_v11  ;;  %v27_v20 = vld [vmem:[%s517_s1 + $0x20] sm:$0xff]  ;;  %v130_v21 = vld [vmem:[%s519_s3 + $0x38] sm:$0xff]  ;;  %v129_v23 = vld [vmem:[%s519_s3 + $0x30] sm:$0xff] }
  0x10   :  { %291 = vmatprep.subr.mxu0 %v31_v12  ;;  %320 = vmatprep.subr.mxu1 %v134_v13  ;;  %v26_v22 = vld [vmem:[%s517_s1 + $0x18] sm:$0xff]  ;;  %v25_v24 = vld [vmem:[%s517_s1 + $0x10] sm:$0xff]  ;;  %v128_v25 = vld [vmem:[%s519_s3 + $0x28] sm:$0xff] }
  0x11   :  { %292 = vmatpush3.msra.mxu0 %v31_v12  ;;  %321 = vmatpush3.msra.mxu1 %v134_v13  ;;  %v24_v26 = vld [vmem:[%s517_s1 + $0x8] sm:$0xff]  ;;  %v127_v27 = vld [vmem:[%s519_s3 + $0x20] sm:$0xff]  ;;  %v126_v30 = vld [vmem:[%s519_s3 + $0x18] sm:$0xff] }
  0x12   :  { %293 = vmatprep.subr.mxu0 %v30_v14  ;;  %322 = vmatprep.subr.mxu1 %v133_v15  ;;  %v23_v28 = vld [vmem:[%s517_s1] sm:$0xff]  ;;  %v22_v29 = vld [vmem:[%s516_s0 + $0x8] sm:$0xff]  ;;  %v125_v31 = vld [vmem:[%s519_s3 + $0x10] sm:$0xff] }
  0x13   :  { %294 = vmatpush3.msra.mxu0 %v30_v14  ;;  %323 = vmatpush3.msra.mxu1 %v133_v15  ;;  %v124_v32 = vld [vmem:[%s519_s3 + $0x8] sm:$0xff]  ;;  %v123_v33 = vld [vmem:[%s519_s3] sm:$0xff]  ;;  %s372_s3 = smov [#allocation2]  }
  0x14   :  { %295 = vmatprep.subr.mxu0 %v29_v16  ;;  %324 = vmatprep.subr.mxu1 %v132_v17  ;;  %v239_v34 = vld [vmem:[%s518_s2] ss:$0 sm:$0xff]  ;;  %s228_s13 = sshll.u32 %s372_s3, 4  ;;  %s229_s13 = int_to_ptr.vmem [resolvable:$true] %s228_s13 }
  0x15   :  { %296 = vmatpush3.msra.mxu0 %v29_v16  ;;  %325 = vmatpush3.msra.mxu1 %v132_v17  ;;  %v240_v41 = vld [vmem:[%s520_s4] ss:$0 sm:$0xff]  ;;  %s350_s2 = scalar_lea.vmem %s229_s13, 256  ;;  %p355_p1 = scmp.lt.s32.totalorder %s229_s13, %s229_s13 }
  0x16   :  { %297 = vmatprep.subr.mxu0 %v28_v18  ;;  %326 = vmatprep.subr.mxu1 %v131_v19  ;;  %p351_p0 = scmp.ne.s32.totalorder %s229_s13, %s350_s2  ;;  %p356_p2 = scmp.lt.s32.totalorder %s350_s2, %s350_s2 }
  0x17   :  { %298 = vmatpush3.msra.mxu0 %v28_v18  ;;  %327 = vmatpush3.msra.mxu1 %v131_v19 }
  0x18   :  { %299 = vmatprep.subr.mxu0 %v27_v20  ;;  %328 = vmatprep.subr.mxu1 %v130_v21  ;;  %p357_p3 = por %p356_p2, %p355_p1 }
  0x19   :  { %300 = vmatpush3.msra.mxu0 %v27_v20  ;;  %329 = vmatpush3.msra.mxu1 %v130_v21 }
  0x1a   :  { %301 = vmatprep.subr.mxu0 %v26_v22  ;;  %330 = vmatprep.subr.mxu1 %v129_v23  ;;  %p358_p4 = pnand %p357_p3, %p351_p0 }
  0x1b   :  { %302 = vmatpush3.msra.mxu0 %v26_v22  ;;  %331 = vmatpush3.msra.mxu1 %v129_v23 }
  0x1c   :  { %303 = vmatprep.subr.mxu0 %v25_v24  ;;  %332 = vmatprep.subr.mxu1 %v128_v25 }
  0x1d   :  { %304 = vmatpush3.msra.mxu0 %v25_v24  ;;  %333 = vmatpush3.msra.mxu1 %v128_v25 }
  0x1e   :  { %305 = vmatprep.subr.mxu0 %v24_v26  ;;  %334 = vmatprep.subr.mxu1 %v127_v27 }
  0x1f   :  { %306 = vmatpush3.msra.mxu0 %v24_v26  ;;  %335 = vmatpush3.msra.mxu1 %v127_v27 }
  0x20   :  { %307 = vmatprep.subr.mxu0 %v23_v28  ;;  %336 = vmatprep.subr.mxu1 %v126_v30 }
  0x21   :  { %308 = vmatpush3.msra.mxu0 %v23_v28  ;;  %337 = vmatpush3.msra.mxu1 %v126_v30 }
  0x22   :  { %310 = vmatmul.mubr.f32.vlgmr.msra.gmra.mxu0 %v22_v29  ;;  %338 = vmatprep.subr.mxu1 %v125_v31 }
  0x23   :  { %339 = vmatpush3.msra.mxu1 %v125_v31 }
  0x24   :  { %340 = vmatprep.subr.mxu1 %v124_v32 }
  0x25   :  { %341 = vmatpush3.msra.mxu1 %v124_v32 }
  0x26   :  { %342 = vmatprep.subr.mxu1 %v123_v33 }
  0x27   :  { %343 = vmatpush3.msra.mxu1 %v123_v33 }
  0xe2   :  { %v311_v35 = vpop.f32.mrf.mxu0 }
  0xe3   :  { %v118_v36 = vadd.f32 %v311_v35, %v239_v34 }
  0xe4   :  { %v112_v37 = vpop.f32.mrf.mxu0 }
  0xe5   :  { %v113_v38 = vadd.f32 %v239_v34, %v112_v37  ;;  %v122_v40 = vmax.f32 %v118_v36, 0.0 }
  0xe7   :  { %v121_v39 = vmax.f32 %v113_v38, 0.0 }
  0xe9   :  { %344 = vmatprep.mubr.f32.mxu1 %v121_v39 }
  0xea   :  { %345 = vmatmul.mubr.f32.vlgmr.msra.gmra.mxu1 %v122_v40 }
 0x1aa   :  { %v346_v42 = vpop.f32.mrf.mxu1 }
 0x1ab   :  { %v218_v43 = vadd.f32 %v346_v42, %v240_v41 }
 0x1ac   :  { %v212_v44 = vpop.f32.mrf.mxu1 }
 0x1ad   :  { %222 = vst [vmem:[#allocation2 + $0x8] sm:$0xff] %v218_v43  ;;  %v213_v45 = vadd.f32 %v240_v41, %v212_v44 }
 0x1af   :  { %221 = vst [vmem:[#allocation2] sm:$0xff] %v213_v45 }
 0x1b0   :  { %361 = shalt.err (!%p358_p4)
}
 0x1b1   :  { %s373_s14 = smov 128   ;;  %s374_s15 = smov 8  }
 0x1b2   :  { %234 = dma.vmem_to_hbm [thread:$0]  %s229_s13, 256, %s521_s5, [#allocation3], %s373_s14, %s373_s14, %s374_s15  }
 0x1b3   :  { %370 = dma.done.wait [#allocation3], 256  }
 0x1b4   :  { %371 = vsyncadd [#allocation3], 4294967040 }
 0x1b5   :  { %238 = vsyncpa [#allocation3], 1 }

</bundles_post_ra>
